<compile_context>
chip_gen: v7x
topology: tpu7x:2x2x1
jax: 0.10.0
libtpu: 0.0.40
codegen_flags: <defaults>
</compile_context>

<pallas_src>
import jax
import jax.numpy as jnp
import numpy as np
from jax.experimental import pallas as pl
from jax.experimental.pallas import tpu as pltpu


def _round_up(n, m):
    return (n + m - 1) // m * m


def mlp_kernel(x_ref, w1_ref, b1_ref, w2_ref, b2_ref, out_ref):
    # x_ref  : [b_tile, K_pad]   row-major batch tile (K = d*d; triu folded into W1)
    # w1_ref : [H_pad, K_pad]    triu-folded layer-1 weight
    # b1_ref : [H_pad, 1]
    # w2_ref : [H_pad, 1]        layer-2 weight as a column
    # b2_ref : [1, 1]            SMEM scalar
    # out_ref: [1, b_tile]       lane-dense output slab
    h = jax.lax.dot_general(
        w1_ref[...], x_ref[...],
        dimension_numbers=(((1,), (1,)), ((), ())),   # contract K on both -> [H_pad, b_tile]
        preferred_element_type=jnp.float32,
    )
    h = jnp.maximum(h + b1_ref[...], 0.0)             # bias + ReLU
    # TODO(synk): nn.Dropout(0.5) is identity in eval mode; train-mode stochastic drop not implemented.
    # Second layer has a single output feature: VPU multiply + sublane reduce
    # instead of an N=1 MXU matmul; result stays lane-dense.
    y = jnp.sum(h * w2_ref[...], axis=0, keepdims=True) + b2_ref[0, 0]
    out_ref[...] = jax.nn.sigmoid(y)                  # EUP exp path


def prepare_params(w1, b1, w2, b2, matrix_dim):
    """One-time (model-load) packing: fold triu gather into W1, pad to TPU tiles.

    w1: [H, F], b1: [H], w2: [1, H], b2: [1]  (PyTorch [out, in] convention),
    F = matrix_dim*(matrix_dim+1)//2 = number of upper-triangular entries.

    Returns W1_full[H_pad, K_pad] (K = d*d) where column i*d + j (i <= j) holds
    w1[:, triu_pos(i, j)] and every other column is 0, so
        W1_full @ sim.reshape(d*d)  ==  w1 @ sim[triu_i, triu_j]   exactly.
    Zero-padded hidden rows / K columns contribute 0 everywhere (exact).
    NOTE: np.triu_indices and torch.triu_indices both enumerate row-major, so
    checkpoint weight columns line up 1:1.
    """
    H, F = np.shape(w1)
    d = matrix_dim
    assert F == d * (d + 1) // 2
    iu0, iu1 = np.triu_indices(d)
    flat_cols = iu0 * d + iu1                       # [F] flat positions in the d*d matrix

    K = d * d
    K_pad = _round_up(K, 128)                       # 256 for d=16 (already aligned)
    H_pad = _round_up(H, 8)

    w1_full = np.zeros((H_pad, K_pad), np.float32)
    w1_full[:H, flat_cols] = np.asarray(w1, np.float32)
    b1p = np.zeros((H_pad, 1), np.float32)
    b1p[:H, 0] = np.asarray(b1, np.float32).reshape(H)
    w2p = np.zeros((H_pad, 1), np.float32)
    w2p[:H, 0] = np.asarray(w2, np.float32).reshape(H)
    b2p = np.asarray(b2, np.float32).reshape(1, 1)
    return jnp.asarray(w1_full), jnp.asarray(b1p), jnp.asarray(w2p), jnp.asarray(b2p)


def mlp_forward(x, w1p, b1p, w2p, b2p, *, b_tile=2048):
    """x: [B, K] row-major (K = matrix_dim**2; triu folded into w1p) -> [B, 1]."""
    B, K = x.shape
    H_pad, K_pad = w1p.shape

    # --- batch tiling (batch lives on lanes inside the kernel) ----------------
    # Cap: 2 (double-buffer) * 4096 * K_pad * 4 B = 8 MiB, under v5e's 16 MiB
    # scoped-VMEM default and far under v7x's 32 MiB scoped / 64 MiB physical.
    b_tile = min(_round_up(b_tile, 128), 4096)
    B_min = _round_up(max(B, 1), 128)
    if b_tile >= B_min:
        # Whole batch would be one tile; split in two when possible so the
        # single "parallel" grid axis feeds both v7x TensorCores.
        b_tile = _round_up(B_min // 2, 128) if B_min >= 256 else B_min
    B_pad = _round_up(B, b_tile)
    num_tiles = B_pad // b_tile

    x = x.astype(jnp.float32)
    if (B_pad, K_pad) != (B, K):
        # Only the ragged last batch tile / K remainder gets padded -- no
        # transpose, no gather in the hot path.
        x = jnp.pad(x, ((0, B_pad - B), (0, K_pad - K)))

    cost = pl.CostEstimate(
        flops=int(2 * B_pad * K_pad * H_pad + 3 * B_pad * H_pad),
        transcendentals=int(B_pad),
        bytes_accessed=int(4 * (B_pad * K_pad + H_pad * K_pad + 2 * H_pad + 1 + B_pad)),
    )

    out = pl.pallas_call(
        mlp_kernel,
        out_shape=jax.ShapeDtypeStruct((1, B_pad), jnp.float32),
        grid_spec=pltpu.PrefetchScalarGridSpec(
            num_scalar_prefetch=0,
            grid=(num_tiles,),
            in_specs=[
                pl.BlockSpec((b_tile, K_pad), lambda i: (i, 0)),    # x: new batch tile per step
                pl.BlockSpec((H_pad, K_pad), lambda i: (0, 0)),     # W1_full: VMEM-resident (~32 KiB)
                pl.BlockSpec((H_pad, 1), lambda i: (0, 0)),         # b1: VMEM-resident
                pl.BlockSpec((H_pad, 1), lambda i: (0, 0)),         # w2 column: VMEM-resident
                pl.BlockSpec(memory_space=pltpu.MemorySpace.SMEM),  # b2 scalar in SMEM
            ],
            out_specs=pl.BlockSpec((1, b_tile), lambda i: (0, i)),  # lane-dense output
        ),
        compiler_params=pltpu.CompilerParams(
            dimension_semantics=("parallel",),   # batch tiles independent; 2 TCs on v7x
        ),
        cost_estimate=cost,
    )(x, w1p, b1p, w2p, b2p)

    return out[0, :B].reshape(B, 1)


@jax.jit
def mlpwcb_forward(sim_matrices, w1p, b1p, w2p, b2p):
    B, d = sim_matrices.shape[0], sim_matrices.shape[1]
    # Free reshape; the triu selection lives inside w1p, so the kernel reads the
    # raw similarity matrices in a single HBM pass.
    x = sim_matrices.reshape(B, d * d)
    return mlp_forward(x, w1p, b1p, w2p, b2p)


if __name__ == "__main__":
    # MLPwCB(matrix_dim=16, n_layers=2, layer_size_factor=[1, 5], dropout=[-1, 0.5])
    B = 2
    matrix_dim = 16
    F = matrix_dim * (matrix_dim + 1) // 2       # 136 = len(triu_indices)
    H = F // 5                                   # 27

    key = jax.random.PRNGKey(0)
    k_x, k_w1, k_b1, k_w2, k_b2 = jax.random.split(key, 5)

    # Deterministic parameter init matching Linear_block: stdv = 1 / in_size / 2
    stdv1 = 1.0 / F / 2.0
    w1 = jax.random.uniform(k_w1, (H, F), jnp.float32, -stdv1, stdv1)
    b1 = jax.random.uniform(k_b1, (H,), jnp.float32, -stdv1, stdv1)
    stdv2 = 1.0 / H / 2.0
    w2 = jax.random.uniform(k_w2, (1, H), jnp.float32, -stdv2, stdv2)
    b2 = jax.random.uniform(k_b2, (1,), jnp.float32, -stdv2, stdv2)

    # Input: batch of similarity matrices [B, matrix_dim, matrix_dim]
    sim_matrices = jax.random.normal(k_x, (B, matrix_dim, matrix_dim), jnp.float32)

    params = prepare_params(w1, b1, w2, b2, matrix_dim)   # done once at "model load" time
    out = mlpwcb_forward(sim_matrices, *params)
    out = jax.block_until_ready(out)

    # Pure-JAX reference (explicit triu gather + dense linears) for correctness.
    iu0, iu1 = jnp.triu_indices(matrix_dim)
    x_ref = sim_matrices[:, iu0, iu1]
    h_ref = jnp.maximum(x_ref @ w1.T + b1[None, :], 0.0)
    y_ref = jax.nn.sigmoid(h_ref @ w2.T + b2[None, :])
    np.testing.assert_allclose(np.asarray(out), np.asarray(y_ref), rtol=1e-5, atol=1e-6)

    print("KERNEL_OK")
</pallas_src>

<mosaic_0001>
module attributes {stable_mosaic.version = 11 : i64} {
  func.func @mlp_kernel(%arg0: i32, %arg1: memref<128x256xf32, #tpu.memory_space<vmem>>, %arg2: memref<32x256xf32, #tpu.memory_space<vmem>>, %arg3: memref<32x1xf32, #tpu.memory_space<vmem>>, %arg4: memref<32x1xf32, #tpu.memory_space<vmem>>, %arg5: memref<1x1xf32, #tpu.memory_space<smem>>, %arg6: memref<1x128xf32, #tpu.memory_space<vmem>>) attributes {dimension_semantics = [#tpu.dimension_semantics<parallel>], iteration_bounds = array<i64: 1>, scalar_prefetch = 0 : i64, scratch_operands = 0 : i64, tpu.core_type = #tpu.core_type<tc>, window_params = [{transform_indices = @transform_0, window_bounds = array<i64: 128, 256>}, {pipeline_mode = #tpu.pipeline_mode<synchronous>, transform_indices = @transform_1, window_bounds = array<i64: 32, 256>}, {pipeline_mode = #tpu.pipeline_mode<synchronous>, transform_indices = @transform_2, window_bounds = array<i64: 32, 1>}, {pipeline_mode = #tpu.pipeline_mode<synchronous>, transform_indices = @transform_3, window_bounds = array<i64: 32, 1>}, {transform_indices = @transform_4, window_bounds = array<i64: 1, 1>}, {transform_indices = @transform_5, window_bounds = array<i64: 1, 128>}]} {
    %c0 = arith.constant 0 : index
    %c0_0 = arith.constant 0 : index
    %0 = vector.load %arg2[%c0, %c0_0] : memref<32x256xf32, #tpu.memory_space<vmem>>, vector<32x256xf32>
    %c0_1 = arith.constant 0 : index
    %c0_2 = arith.constant 0 : index
    %1 = vector.load %arg1[%c0_1, %c0_2] : memref<128x256xf32, #tpu.memory_space<vmem>>, vector<128x256xf32>
    %cst = arith.constant dense<0.000000e+00> : vector<32x128xf32>
    %2 = tpu.matmul %0, %1, %cst {dimension_numbers = #tpu.dot_dimension_numbers<[1], [1], [0], [0], [0, 0, 1, 0], [], []>} : vector<32x256xf32>, vector<128x256xf32>, vector<32x128xf32> -> vector<32x128xf32>
    %c0_3 = arith.constant 0 : index
    %c0_4 = arith.constant 0 : index
    %3 = vector.load %arg3[%c0_3, %c0_4] : memref<32x1xf32, #tpu.memory_space<vmem>>, vector<32x1xf32>
    %4 = vector.broadcast %3 : vector<32x1xf32> to vector<32x128xf32>
    %5 = arith.addf %2, %4 : vector<32x128xf32>
    %cst_5 = arith.constant 0.000000e+00 : f32
    %6 = vector.broadcast %cst_5 : f32 to vector<32x128xf32>
    %7 = arith.maximumf %5, %6 : vector<32x128xf32>
    %c0_6 = arith.constant 0 : index
    %c0_7 = arith.constant 0 : index
    %8 = vector.load %arg4[%c0_6, %c0_7] : memref<32x1xf32, #tpu.memory_space<vmem>>, vector<32x1xf32>
    %9 = vector.broadcast %8 : vector<32x1xf32> to vector<32x128xf32>
    %10 = arith.mulf %7, %9 : vector<32x128xf32>
    %cst_8 = arith.constant dense<0.000000e+00> : vector<128xf32>
    %11 = vector.multi_reduction <add>, %10, %cst_8 [0] : vector<32x128xf32> to vector<128xf32>
    %12 = vector.shape_cast %11 : vector<128xf32> to vector<1x128xf32>
    %c0_9 = arith.constant 0 : index
    %c0_10 = arith.constant 0 : index
    %13 = memref.load %arg5[%c0_9, %c0_10] : memref<1x1xf32, #tpu.memory_space<smem>>
    %14 = vector.broadcast %13 : f32 to vector<1x128xf32>
    %15 = arith.addf %12, %14 : vector<1x128xf32>
    %16 = arith.negf %15 : vector<1x128xf32>
    %17 = math.exp %16 : vector<1x128xf32>
    %cst_11 = arith.constant 1.000000e+00 : f32
    %18 = vector.broadcast %cst_11 : f32 to vector<1x128xf32>
    %19 = arith.addf %18, %17 : vector<1x128xf32>
    %20 = arith.divf %18, %19 : vector<1x128xf32>
    %c0_12 = arith.constant 0 : index
    %c0_13 = arith.constant 0 : index
    %21 = vector.load %arg6[%c0_12, %c0_13] : memref<1x128xf32, #tpu.memory_space<vmem>>, vector<1x128xf32>
    tpu.vector_store %arg6[%c0_12, %c0_13], %20 {strides = array<i32>} : memref<1x128xf32, #tpu.memory_space<vmem>>, vector<1x128xf32>,
    return
  }
  func.func @transform_0(%arg0: i32) -> (i32, i32) {
    %c0_i32 = arith.constant 0 : i32
    %c0_i32_0 = arith.constant 0 : i32
    return %arg0, %c0_i32 : i32, i32
  }
  func.func @transform_1(%arg0: i32) -> (i32, i32) {
    %c0_i32 = arith.constant 0 : i32
    %c0_i32_0 = arith.constant 0 : i32
    %c0_i32_1 = arith.constant 0 : i32
    return %c0_i32, %c0_i32_0 : i32, i32
  }
  func.func @transform_2(%arg0: i32) -> (i32, i32) {
    %c0_i32 = arith.constant 0 : i32
    %c0_i32_0 = arith.constant 0 : i32
    %c0_i32_1 = arith.constant 0 : i32
    return %c0_i32, %c0_i32_0 : i32, i32
  }
  func.func @transform_3(%arg0: i32) -> (i32, i32) {
    %c0_i32 = arith.constant 0 : i32
    %c0_i32_0 = arith.constant 0 : i32
    %c0_i32_1 = arith.constant 0 : i32
    return %c0_i32, %c0_i32_0 : i32, i32
  }
  func.func @transform_4(%arg0: i32) -> (i32, i32) {
    %c0_i32 = arith.constant 0 : i32
    %c0_i32_0 = arith.constant 0 : i32
    %c0_i32_1 = arith.constant 0 : i32
    return %c0_i32, %c0_i32_0 : i32, i32
  }
  func.func @transform_5(%arg0: i32) -> (i32, i32) {
    %c0_i32 = arith.constant 0 : i32
    %c0_i32_0 = arith.constant 0 : i32
    return %c0_i32, %arg0 : i32, i32
  }
}

</mosaic_0001>

<bundles_post_ra>
// kernel: mlpwcb_forward.1
= control target key start
LH: loop header
LB: loop body
LE: loop exit
PB: predicated region body
PF: predicated region fallthrough
CT: control target
= control target key end

     0   :  { %v281_v3 = vmov 0   ;;  %s462_s0 = inlined_call_operand.vmem [shape: f32[128,256], index: 0, kind: input, shape index: {}]   ;;  %s463_s1 = inlined_call_operand.vmem [shape: f32[32,256], index: 1, kind: input, shape index: {}]   ;;  %s464_s2 = inlined_call_operand.vmem [shape: f32[32,1], index: 2, kind: input, shape index: {}]   ;;  %s465_s3 = inlined_call_operand.vmem [shape: f32[32,1], index: 3, kind: input, shape index: {}]   ;;  %s466_s4 = inlined_call_operand.<no memory space> [shape: f32[1,1], index: 4, kind: input, shape index: {}]   ;;  %s467_s5 = inlined_call_operand.vmem [shape: f32[1,128], index: 5, kind: output, shape index: {}]  }
   0x1   :  { %v30_v0 = vld [vmem:[%s462_s0 + $0x8] sm:$0xff]  ;;  %v32_v1 = vld [vmem:[%s462_s0 + $0x18] sm:$0xff]  ;;  %v29_v2 = vld [vmem:[%s462_s0] sm:$0xff]  ;;  %275 = vset.pattern.permute.xlu0 %v281_v3  ;;  %276 = vset.pattern.permute.xlu1 %v281_v3 }
   0x2   :  { %v226_v4 = vpack.c.bf16 %v32_v1, %v30_v0  ;;  %v31_v5 = vld [vmem:[%s462_s0 + $0x10] sm:$0xff]  ;;  %v34_v6 = vld [vmem:[%s462_s0 + $0x28] sm:$0xff]  ;;  %v36_v7 = vld [vmem:[%s462_s0 + $0x38] sm:$0xff] }
   0x3   :  { %v228_v8 = vpack.c.bf16 %v31_v5, %v29_v2  ;;  %v230_v9 = vpack.c.bf16 %v36_v7, %v34_v6  ;;  %v33_v10 = vld [vmem:[%s462_s0 + $0x20] sm:$0xff]  ;;  %v35_v11 = vld [vmem:[%s462_s0 + $0x30] sm:$0xff]  ;;  %v38_v12 = vld [vmem:[%s462_s0 + $0x48] sm:$0xff] }
   0x4   :  { %227 = vmatprep.subr.bf16.mxu0 %v226_v4  ;;  %258 = vmatprep.subr.bf16.mxu1 %v226_v4  ;;  %v40_v13 = vld [vmem:[%s462_s0 + $0x58] sm:$0xff]  ;;  %v232_v14 = vpack.c.bf16 %v35_v11, %v33_v10  ;;  %v22_v16 = vld [vmem:[%s463_s1 + $0x8] sm:$0xff]  ;;  %v37_v18 = vld [vmem:[%s462_s0 + $0x40] sm:$0xff] }
   0x5   :  { %229 = vmatpush1.bf16.xpose.msra.mxu0 %v228_v8  ;;  %266 = vmatpush1.bf16.xpose.msra.mxu1 %v228_v8  ;;  %v234_v15 = vpack.c.bf16 %v40_v13, %v38_v12  ;;  %v26_v17 = vld [vmem:[%s463_s1 + $0x28] sm:$0xff]  ;;  %v39_v19 = vld [vmem:[%s462_s0 + $0x50] sm:$0xff]  ;;  %v61_v20 = vld [vmem:[%s464_s2] sm:$0xff] }
   0x6   :  { %231 = vmatprep.subr.bf16.mxu0 %v230_v9  ;;  %259 = vmatprep.subr.bf16.mxu1 %v230_v9  ;;  %v63_v21 = vld [vmem:[%s464_s2 + $0x10] sm:$0xff]  ;;  %v42_v22 = vld [vmem:[%s462_s0 + $0x68] sm:$0xff]  ;;  %v44_v23 = vld [vmem:[%s462_s0 + $0x78] sm:$0xff]  ;;  %v236_v25 = vpack.c.bf16 %v39_v19, %v37_v18 }
   0x7   :  { %149 = vmatprep.mubr.f32.mxu0 %v22_v16  ;;  %159 = vmatprep.mubr.f32.mxu1 %v26_v17  ;;  %v62_v24 = vld [vmem:[%s464_s2 + $0x8] sm:$0xff]  ;;  %v64_v26 = vld [vmem:[%s464_s2 + $0x18] sm:$0xff]  ;;  %v238_v27 = vpack.c.bf16 %v44_v23, %v42_v22  ;;  %v174_v28 = vld [vmem:[%s465_s3] sm:$0xff] }
   0x8   :  { %67 = vperm.xlu0 %275, %v61_v20   ;;  %77 = vperm.xlu1 %276, %v63_v21   ;;  %v175_v29 = vld [vmem:[%s465_s3 + $0x8] sm:$0xff]  ;;  %v41_v30 = vld [vmem:[%s462_s0 + $0x60] sm:$0xff]  ;;  %v43_v31 = vld [vmem:[%s462_s0 + $0x70] sm:$0xff] }
   0x9   :  { %v46_v32 = vld [vmem:[%s462_s0 + $0x88] sm:$0xff]  ;;  %v48_v33 = vld [vmem:[%s462_s0 + $0x98] sm:$0xff]  ;;  %v176_v34 = vld [vmem:[%s465_s3 + $0x10] sm:$0xff]  ;;  %v240_v35 = vpack.c.bf16 %v43_v31, %v41_v30 }
   0xa   :  { %v177_v36 = vld [vmem:[%s465_s3 + $0x18] sm:$0xff]  ;;  %v242_v37 = vpack.c.bf16 %v48_v33, %v46_v32  ;;  %v45_v38 = vld [vmem:[%s462_s0 + $0x80] sm:$0xff]  ;;  %v47_v39 = vld [vmem:[%s462_s0 + $0x90] sm:$0xff] }
   0xb   :  { %v50_v40 = vld [vmem:[%s462_s0 + $0xa8] sm:$0xff]  ;;  %v52_v41 = vld [vmem:[%s462_s0 + $0xb8] sm:$0xff]  ;;  %v244_v42 = vpack.c.bf16 %v47_v39, %v45_v38  ;;  %v49_v44 = vld [vmem:[%s462_s0 + $0xa0] sm:$0xff] }
   0xc   :  { %72 = vperm.xlu0 %275, %v62_v24   ;;  %82 = vperm.xlu1 %276, %v64_v26   ;;  %v246_v43 = vpack.c.bf16 %v52_v41, %v50_v40  ;;  %v51_v45 = vld [vmem:[%s462_s0 + $0xb0] sm:$0xff]  ;;  %v54_v46 = vld [vmem:[%s462_s0 + $0xc8] sm:$0xff]  ;;  %v56_v47 = vld [vmem:[%s462_s0 + $0xd8] sm:$0xff] }
   0xd   :  { %233 = vmatpush1.bf16.xpose.msra.mxu0 %v232_v14  ;;  %267 = vmatpush1.bf16.xpose.msra.mxu1 %v232_v14  ;;  %v248_v48 = vpack.c.bf16 %v51_v45, %v49_v44  ;;  %v250_v49 = vpack.c.bf16 %v56_v47, %v54_v46  ;;  %v53_v50 = vld [vmem:[%s462_s0 + $0xc0] sm:$0xff]  ;;  %v55_v51 = vld [vmem:[%s462_s0 + $0xd0] sm:$0xff]  ;;  %v58_v52 = vld [vmem:[%s462_s0 + $0xe8] sm:$0xff] }
   0xe   :  { %235 = vmatprep.subr.bf16.mxu0 %v234_v15  ;;  %260 = vmatprep.subr.bf16.mxu1 %v234_v15  ;;  %v60_v53 = vld [vmem:[%s462_s0 + $0xf8] sm:$0xff]  ;;  %v252_v54 = vpack.c.bf16 %v55_v51, %v53_v50  ;;  %v57_v56 = vld [vmem:[%s462_s0 + $0xe0] sm:$0xff]  ;;  %v59_v57 = vld [vmem:[%s462_s0 + $0xf0] sm:$0xff] }
   0xf   :  { %v254_v55 = vpack.c.bf16 %v60_v53, %v58_v52  ;;  %v256_v58 = vpack.c.bf16 %v59_v57, %v57_v56  ;;  %v21_v59 = vld [vmem:[%s463_s1] sm:$0xff]  ;;  %v24_v61 = vld [vmem:[%s463_s1 + $0x18] sm:$0xff]  ;;  %v23_v63 = vld [vmem:[%s463_s1 + $0x10] sm:$0xff] }
  0x10   :  { %180 = vperm.xlu0 %275, %v174_v28   ;;  %185 = vperm.xlu1 %276, %v175_v29   ;;  %v25_v60 = vld [vmem:[%s463_s1 + $0x20] sm:$0xff]  ;;  %v28_v62 = vld [vmem:[%s463_s1 + $0x38] sm:$0xff]  ;;  %v27_v0 = vld [vmem:[%s463_s1 + $0x30] sm:$0xff] }
  0x14   :  { %190 = vperm.xlu0 %275, %v176_v34   ;;  %195 = vperm.xlu1 %276, %v177_v36  }
  0x15   :  { %237 = vmatpush1.bf16.xpose.msra.mxu0 %v236_v25  ;;  %268 = vmatpush1.bf16.xpose.msra.mxu1 %v236_v25 }
  0x16   :  { %239 = vmatprep.subr.bf16.mxu0 %v238_v27  ;;  %261 = vmatprep.subr.bf16.mxu1 %v238_v27 }
  0x1d   :  { %241 = vmatpush1.bf16.xpose.msra.mxu0 %v240_v35  ;;  %269 = vmatpush1.bf16.xpose.msra.mxu1 %v240_v35 }
  0x1e   :  { %243 = vmatprep.subr.bf16.mxu0 %v242_v37  ;;  %262 = vmatprep.subr.bf16.mxu1 %v242_v37  ;;  %v212_v37 = vstv %s466_s4 }
  0x25   :  { %245 = vmatpush1.bf16.xpose.msra.mxu0 %v244_v42  ;;  %270 = vmatpush1.bf16.xpose.msra.mxu1 %v244_v42 }
  0x26   :  { %247 = vmatprep.subr.bf16.mxu0 %v246_v43  ;;  %263 = vmatprep.subr.bf16.mxu1 %v246_v43 }
  0x2d   :  { %249 = vmatpush1.bf16.xpose.msra.mxu0 %v248_v48  ;;  %271 = vmatpush1.bf16.xpose.msra.mxu1 %v248_v48 }
  0x2e   :  { %251 = vmatprep.subr.bf16.mxu0 %v250_v49  ;;  %264 = vmatprep.subr.bf16.mxu1 %v250_v49 }
  0x35   :  { %253 = vmatpush1.bf16.xpose.msra.mxu0 %v252_v54  ;;  %272 = vmatpush1.bf16.xpose.msra.mxu1 %v252_v54 }
  0x36   :  { %255 = vmatprep.subr.bf16.mxu0 %v254_v55  ;;  %265 = vmatprep.subr.bf16.mxu1 %v254_v55 }
  0x3d   :  { %257 = vmatpush1.bf16.xpose.msra.mxu0 %v256_v58  ;;  %273 = vmatpush1.bf16.xpose.msra.mxu1 %v256_v58 }
  0x44   :  { %150 = vmatmul.mubr.f32.vlgmr.msra.gmra.mrb[0].mxu0 %v21_v59  ;;  %160 = vmatmul.mubr.f32.vlgmr.msra.gmra.mrb[0].mxu1 %v25_v60 }
  0x45   :  { %154 = vmatprep.mubr.f32.mxu0 %v24_v61  ;;  %164 = vmatprep.mubr.f32.mxu1 %v28_v62 }
  0x48   :  { %155 = vmatmul.mubr.f32.gmra.mrb[2].mxu0 %v23_v63  ;;  %165 = vmatmul.mubr.f32.gmra.mrb[2].mxu1 %v27_v0 }
  0x87   :  { %v68_v1 = vpop.permute.xlu0 %67  ;;  %v78_v2 = vpop.permute.xlu1 %77 }
  0x8b   :  { %v73_v3 = vpop.permute.xlu0 %72  ;;  %v83_v4 = vpop.permute.xlu1 %82 }
  0x8f   :  { %v181_v10 = vpop.permute.xlu0 %180  ;;  %v186_v19 = vpop.permute.xlu1 %185 }
  0x93   :  { %v191_v25 = vpop.permute.xlu0 %190  ;;  %v196_v28 = vpop.permute.xlu1 %195 }
 0x117   :  { %v151_v5 = vpop.f32.mrb[0].mxu0  ;;  %v161_v6 = vpop.f32.mrb[0].mxu1 }
 0x118   :  { %v152_v7 = vadd.f32 %v151_v5, %v68_v1  ;;  %v153_v8 = vpop.f32.mrb[1].mxu0  ;;  %v163_v9 = vpop.f32.mrb[1].mxu1  ;;  %v162_v11 = vadd.f32 %v161_v6, %v78_v2 }
 0x11a   :  { %v170_v14 = vmax.f32 %v152_v7, 0.0  ;;  %v172_v20 = vmax.f32 %v162_v11, 0.0 }
 0x11b   :  { %v156_v12 = vpop.f32.mrb[2].mxu0  ;;  %v166_v13 = vpop.f32.mrb[2].mxu1 }
 0x11c   :  { %v157_v15 = vadd.f32 %v156_v12, %v73_v3  ;;  %v167_v16 = vadd.f32 %v166_v13, %v83_v4  ;;  %v158_v17 = vpop.f32.mrb[3].mxu0  ;;  %v168_v18 = vpop.f32.mrb[3].mxu1  ;;  %v198_v22 = vmul.f32 %v181_v10, %v170_v14  ;;  %v200_v26 = vmul.f32 %v191_v25, %v172_v20 }
 0x11e   :  { %v171_v21 = vmax.f32 %v157_v15, 0.0  ;;  %v173_v24 = vmax.f32 %v167_v16, 0.0 }
 0x120   :  { %v199_v23 = vmul.f32 %v186_v19, %v171_v21  ;;  %v201_v29 = vmul.f32 %v196_v28, %v173_v24 }
 0x122   :  { %v202_v27 = vadd.f32 %v199_v23, %v198_v22 }
 0x124   :  { %v203_v30 = vadd.f32 %v202_v27, %v200_v26 }
 0x126   :  { %v204_v31 = vadd.f32 %v203_v30, %v201_v29 }
 0x128   :  { %v205_v32 = vrot.slane %v204_v31, 4 }
 0x12a   :  { %v206_v33 = vadd.f32 %v205_v32, %v204_v31 }
 0x12c   :  { %v207_v34 = vrot.slane %v206_v33, 2 }
 0x12e   :  { %v208_v35 = vadd.f32 %v207_v34, %v206_v33 }
 0x130   :  { %v209_v36 = vrot.slane %v208_v35, 1 }
 0x132   :  { %v210_v38 = vadd.f32 %v209_v36, %v208_v35 }
 0x134   :  { %v213_v39 = vadd.f32 %v212_v37, %v210_v38 }
 0x136   :  { %v225_v40 = vmul.f32 -1.442695, %v213_v39 }
 0x138   :  { %277 = vpow2.f32 %v225_v40 }
 0x142   :  { %v278_v41 = vpop.eup %277 }
 0x143   :  { %v217_v42 = vadd.f32 1.0, %v278_v41 }
 0x145   :  { %279 = vrcp.f32 %v217_v42 }
 0x14f   :  { %v280_v43 = vpop.eup %279 }
 0x150   :  { %220 = vst [vmem:[%s467_s5] sm:$0x1] %v280_v43 }

</bundles_post_ra>
